<compile_context>
chip_gen: v5e
topology: v5e:2x2
jax: 0.10.0
libtpu: 0.0.40
codegen_flags: <defaults>
</compile_context>

<pallas_src>
import math
import numpy as np
import jax
import jax.numpy as jnp
from jax.experimental import pallas as pl
from jax.experimental.pallas import tpu as pltpu


def _next_pow2(n: int) -> int:
    p = 1
    while p < n:
        p *= 2
    return p


def _pick_group(res: int, npad: int, slab_budget: int = 8 << 20) -> int:
    """How many batch items to pack side-by-side along lanes in one sort slab."""
    if res >= 128:
        g = 1
    else:
        g = 128 // math.gcd(res, 128)       # smallest g with (g*res) % 128 == 0
    while g > 1 and npad * g * res * 4 > slab_budget:
        g //= 2                             # degrade lane density before blowing VMEM
    return g


def _bitonic_sort_rows(x, bits, npad: int, lanes: int):
    """Ascending bitonic sort along axis 0 of a (npad, lanes) f32 array.

    npad is a power of two >= 8.  bits[b] is the hoisted (npad, 1) bool mask
    "bit b of the row index is set".  Columns are independent, so one network sorts
    every packed batch item at once.
      j >= 8 : partner x[i^j] == rotate-by-j inside each 2j-row group, built from
               tile-aligned slices + concat (no XLU, no partner select).
      j <  8 : partner via two pltpu.roll sublane rotations + bit-j select.
    Rows padded with +inf sort to the bottom.
    """
    k = 2
    while k <= npad:
        kb = k.bit_length() - 1
        j = k // 2
        while j >= 1:
            jb = j.bit_length() - 1
            if j >= 8:
                grp = x.reshape(npad // (2 * j), 2 * j, lanes)
                partner = jnp.concatenate(
                    [grp[:, j:, :], grp[:, :j, :]], axis=1).reshape(npad, lanes)
            else:
                up = pltpu.roll(x, npad - j, axis=0)      # x[(i + j) % npad]
                dn = pltpu.roll(x, j, axis=0)             # x[(i - j) % npad]
                partner = jnp.where(bits[jb], dn, up)     # == x[i ^ j]
            mn = jnp.minimum(x, partner)
            mx = jnp.maximum(x, partner)
            take_min = bits[jb] == bits[kb]               # XNOR -> ascending direction
            x = jnp.where(take_min, mn, mx)
            j //= 2
        k *= 2
    return x


def _make_kernel(n_valid: int, npad: int, out_rows: int, lanes: int):
    n_bits = npad.bit_length()                            # bits 0 .. log2(npad)

    def kernel(x_ref, w_ref, o_ref):
        # x_ref: (1, N, 2G)   w_ref: (2G, G*res)   o_ref: (1, out_rows, G*res)
        proj = jnp.dot(x_ref[0], w_ref[...],
                       preferred_element_type=jnp.float32,
                       precision=jax.lax.Precision.HIGHEST)       # (N, lanes)
        if npad > n_valid:                                # pad rows in-register
            pad = jnp.full((npad - n_valid, lanes), jnp.inf, dtype=jnp.float32)
            proj = jnp.concatenate([proj, pad], axis=0)
        # Hoisted bit-plane masks of the row index (one (npad, 1) mask per bit).
        row = jax.lax.broadcasted_iota(jnp.int32, (npad, 1), 0)
        bits = [((row >> b) & 1) == 1 for b in range(n_bits)]
        srt = _bitonic_sort_rows(proj, bits, npad, lanes)
        o_ref[0] = srt if out_rows == npad else srt[:out_rows, :]

    return kernel


def sliced_wasserstein(b, d, res: int):
    """Pallas implementation of SlicedWasserstein(res).forward(b, d).

    b, d: (B, N) float32.  Returns (B, N, res) float32, sorted ascending along axis -2.
    """
    B, N = b.shape
    npad = max(8, _next_pow2(N))                  # power-of-two sort length, >= 1 tile
    G = _pick_group(res, npad)                    # batch items packed per sort slab
    lanes = G * res
    num_groups = -(-B // G)
    b_pad_rows = num_groups * G
    out_rows = N if N % 8 == 0 else npad          # keep in-kernel slices tile-aligned

    # Constant block-diagonal projection matrix: column block g carries the cos/sin
    # rows scaling packed batch item g (also performs the lane packing).
    theta = np.pi * np.linspace(0.0, 1.0, res + 2)[1:res + 1]
    ct = np.cos(theta).astype(np.float32)
    st = np.sin(theta).astype(np.float32)
    w_np = np.zeros((2 * G, lanes), dtype=np.float32)
    for g in range(G):
        w_np[g, g * res:(g + 1) * res] = ct
        w_np[G + g, g * res:(g + 1) * res] = st
    w = jnp.asarray(w_np)

    b32 = b.astype(jnp.float32)
    d32 = d.astype(jnp.float32)
    if b_pad_rows != B:
        cfg = ((0, b_pad_rows - B), (0, 0))
        b32 = jnp.pad(b32, cfg)
        d32 = jnp.pad(d32, cfg)
    # (num_groups, N, 2G): the G b-columns then the G d-columns of each group;
    # each grid step's block is fully contiguous in HBM.
    bt = b32.reshape(num_groups, G, N).transpose(0, 2, 1)
    dt = d32.reshape(num_groups, G, N).transpose(0, 2, 1)
    x_in = jnp.concatenate([bt, dt], axis=-1)

    # VMEM budget: double-buffered in/out/W blocks + live sort slabs.
    in_block = (-(-N // 8) * 8) * (-(-2 * G // 128) * 128) * 4
    w_block = (-(-2 * G // 8) * 8) * lanes * 4
    out_block = out_rows * lanes * 4
    slab = npad * lanes * 4
    vmem_est = 2 * (in_block + w_block + out_block) + 6 * slab + (2 << 20)
    vmem_limit = int(min(max(vmem_est, 32 << 20), 64 << 20))

    log2n = npad.bit_length() - 1
    n_pass = log2n * (log2n + 1) // 2
    cost = pl.CostEstimate(
        flops=int(num_groups * (2 * N * (2 * G) * lanes + 3 * n_pass * npad * lanes)),
        transcendentals=0,
        bytes_accessed=int(x_in.size * 4 + w.size * 4
                           + num_groups * out_rows * lanes * 4),
    )

    out = pl.pallas_call(
        _make_kernel(N, npad, out_rows, lanes),
        out_shape=jax.ShapeDtypeStruct((num_groups, out_rows, lanes), jnp.float32),
        grid_spec=pltpu.PrefetchScalarGridSpec(
            num_scalar_prefetch=0,
            grid=(num_groups,),
            in_specs=[
                pl.BlockSpec((1, N, 2 * G), lambda i: (i, 0, 0)),
                pl.BlockSpec((2 * G, lanes), lambda i: (0, 0)),   # constant -> DMA'd once
            ],
            out_specs=pl.BlockSpec((1, out_rows, lanes), lambda i: (i, 0, 0)),
        ),
        compiler_params=pltpu.CompilerParams(
            dimension_semantics=("parallel",),
            vmem_limit_bytes=vmem_limit),
        cost_estimate=cost,
    )(x_in, w)

    # Unpack: drop +inf pad rows, split lanes back into (item-in-group, res),
    # restore the (B, N, res) layout.  (Lane-dense kernel stores; cheap XLA reshape.)
    out = out[:, :N, :]
    out = out.reshape(num_groups, N, G, res).transpose(0, 2, 1, 3)
    out = out.reshape(b_pad_rows, N, res)[:B]
    return out


if __name__ == "__main__":
    B, N, RES = 2, 8, 16
    key = jax.random.PRNGKey(0)
    kb_, kd_ = jax.random.split(key)
    b = jax.random.uniform(kb_, (B, N), dtype=jnp.float32)
    d = jax.random.uniform(kd_, (B, N), dtype=jnp.float32)

    out = sliced_wasserstein(b, d, RES)
    out = jax.block_until_ready(out)

    # Pure-JAX reference (same math as the PyTorch module).
    theta = np.pi * np.linspace(0.0, 1.0, RES + 2)[1:RES + 1]
    ct = jnp.asarray(np.cos(theta), jnp.float32)
    st = jnp.asarray(np.sin(theta), jnp.float32)
    ref = jnp.sort(ct * b[..., None] + st * d[..., None], axis=-2)
    np.testing.assert_allclose(np.asarray(out), np.asarray(ref), rtol=1e-4, atol=1e-4)

    print("KERNEL_OK")
</pallas_src>

<mosaic_0001>
module attributes {stable_mosaic.version = 11 : i64} {
  func.func @kernel(%arg0: i32, %arg1: memref<1x8x16xf32, #tpu.memory_space<vmem>>, %arg2: memref<16x128xf32, #tpu.memory_space<vmem>>, %arg3: memref<1x8x128xf32, #tpu.memory_space<vmem>>) attributes {dimension_semantics = [#tpu.dimension_semantics<parallel>], iteration_bounds = array<i64: 1>, scalar_prefetch = 0 : i64, scratch_operands = 0 : i64, tpu.core_type = #tpu.core_type<tc>, window_params = [{transform_indices = @transform_0, window_bounds = array<i64: 1, 8, 16>}, {pipeline_mode = #tpu.pipeline_mode<synchronous>, transform_indices = @transform_1, window_bounds = array<i64: 16, 128>}, {transform_indices = @transform_2, window_bounds = array<i64: 1, 8, 128>}]} {
    %c0 = arith.constant 0 : index
    %c0_0 = arith.constant 0 : index
    %c0_1 = arith.constant 0 : index
    %0 = vector.load %arg1[%c0, %c0_0, %c0_1] : memref<1x8x16xf32, #tpu.memory_space<vmem>>, vector<1x8x16xf32>
    %1 = vector.shape_cast %0 : vector<1x8x16xf32> to vector<8x16xf32>
    %c0_2 = arith.constant 0 : index
    %c0_3 = arith.constant 0 : index
    %2 = vector.load %arg2[%c0_2, %c0_3] : memref<16x128xf32, #tpu.memory_space<vmem>>, vector<16x128xf32>
    %cst = arith.constant dense<0.000000e+00> : vector<8x128xf32>
    %3 = tpu.matmul %1, %2, %cst {dimension_numbers = #tpu.dot_dimension_numbers<[1], [0], [0], [1], [0, 0, 1, 1], [], []>, precision = #tpu.contract_precision<fp32>} : vector<8x16xf32>, vector<16x128xf32>, vector<8x128xf32> -> vector<8x128xf32>
    %4 = tpu.iota {dimensions = array<i32: 0>} : vector<8x1xi32>
    %c0_i32 = arith.constant 0 : i32
    %5 = vector.broadcast %c0_i32 : i32 to vector<8x1xi32>
    %6 = arith.shrsi %4, %5 : vector<8x1xi32>
    %c1_i32 = arith.constant 1 : i32
    %7 = vector.broadcast %c1_i32 : i32 to vector<8x1xi32>
    %8 = arith.andi %6, %7 : vector<8x1xi32>
    %c1_i32_4 = arith.constant 1 : i32
    %9 = vector.broadcast %c1_i32_4 : i32 to vector<8x1xi32>
    %10 = arith.cmpi eq, %8, %9 : vector<8x1xi32>
    %c1_i32_5 = arith.constant 1 : i32
    %11 = vector.broadcast %c1_i32_5 : i32 to vector<8x1xi32>
    %12 = arith.shrsi %4, %11 : vector<8x1xi32>
    %c1_i32_6 = arith.constant 1 : i32
    %13 = vector.broadcast %c1_i32_6 : i32 to vector<8x1xi32>
    %14 = arith.andi %12, %13 : vector<8x1xi32>
    %c1_i32_7 = arith.constant 1 : i32
    %15 = vector.broadcast %c1_i32_7 : i32 to vector<8x1xi32>
    %16 = arith.cmpi eq, %14, %15 : vector<8x1xi32>
    %c2_i32 = arith.constant 2 : i32
    %17 = vector.broadcast %c2_i32 : i32 to vector<8x1xi32>
    %18 = arith.shrsi %4, %17 : vector<8x1xi32>
    %c1_i32_8 = arith.constant 1 : i32
    %19 = vector.broadcast %c1_i32_8 : i32 to vector<8x1xi32>
    %20 = arith.andi %18, %19 : vector<8x1xi32>
    %c1_i32_9 = arith.constant 1 : i32
    %21 = vector.broadcast %c1_i32_9 : i32 to vector<8x1xi32>
    %22 = arith.cmpi eq, %20, %21 : vector<8x1xi32>
    %c3_i32 = arith.constant 3 : i32
    %23 = vector.broadcast %c3_i32 : i32 to vector<8x1xi32>
    %24 = arith.shrsi %4, %23 : vector<8x1xi32>
    %c1_i32_10 = arith.constant 1 : i32
    %25 = vector.broadcast %c1_i32_10 : i32 to vector<8x1xi32>
    %26 = arith.andi %24, %25 : vector<8x1xi32>
    %c1_i32_11 = arith.constant 1 : i32
    %27 = vector.broadcast %c1_i32_11 : i32 to vector<8x1xi32>
    %28 = arith.cmpi eq, %26, %27 : vector<8x1xi32>
    %c7_i32 = arith.constant 7 : i32
    %29 = tpu.dynamic_rotate %3 by %c7_i32 dim 0 : vector<8x128xf32>, i32 -> vector<8x128xf32>
    %c1_i32_12 = arith.constant 1 : i32
    %30 = tpu.dynamic_rotate %3 by %c1_i32_12 dim 0 : vector<8x128xf32>, i32 -> vector<8x128xf32>
    %31 = vector.shape_cast %10 : vector<8x1xi1> to vector<8x1xi1>
    %32 = vector.broadcast %31 : vector<8x1xi1> to vector<8x128xi1>
    %33 = arith.select %32, %30, %29 : vector<8x128xi1>, vector<8x128xf32>
    %34 = arith.minimumf %3, %33 : vector<8x128xf32>
    %35 = arith.maximumf %3, %33 : vector<8x128xf32>
    %36 = arith.xori %10, %16 : vector<8x1xi1>
    %cst_13 = arith.constant dense<true> : vector<8x1xi1>
    %37 = arith.xori %36, %cst_13 : vector<8x1xi1>
    %38 = vector.shape_cast %37 : vector<8x1xi1> to vector<8x1xi1>
    %39 = vector.broadcast %38 : vector<8x1xi1> to vector<8x128xi1>
    %40 = arith.select %39, %34, %35 : vector<8x128xi1>, vector<8x128xf32>
    %c6_i32 = arith.constant 6 : i32
    %41 = tpu.dynamic_rotate %40 by %c6_i32 dim 0 : vector<8x128xf32>, i32 -> vector<8x128xf32>
    %c2_i32_14 = arith.constant 2 : i32
    %42 = tpu.dynamic_rotate %40 by %c2_i32_14 dim 0 : vector<8x128xf32>, i32 -> vector<8x128xf32>
    %43 = vector.shape_cast %16 : vector<8x1xi1> to vector<8x1xi1>
    %44 = vector.broadcast %43 : vector<8x1xi1> to vector<8x128xi1>
    %45 = arith.select %44, %42, %41 : vector<8x128xi1>, vector<8x128xf32>
    %46 = arith.minimumf %40, %45 : vector<8x128xf32>
    %47 = arith.maximumf %40, %45 : vector<8x128xf32>
    %48 = arith.xori %16, %22 : vector<8x1xi1>
    %cst_15 = arith.constant dense<true> : vector<8x1xi1>
    %49 = arith.xori %48, %cst_15 : vector<8x1xi1>
    %50 = vector.shape_cast %49 : vector<8x1xi1> to vector<8x1xi1>
    %51 = vector.broadcast %50 : vector<8x1xi1> to vector<8x128xi1>
    %52 = arith.select %51, %46, %47 : vector<8x128xi1>, vector<8x128xf32>
    %c7_i32_16 = arith.constant 7 : i32
    %53 = tpu.dynamic_rotate %52 by %c7_i32_16 dim 0 : vector<8x128xf32>, i32 -> vector<8x128xf32>
    %c1_i32_17 = arith.constant 1 : i32
    %54 = tpu.dynamic_rotate %52 by %c1_i32_17 dim 0 : vector<8x128xf32>, i32 -> vector<8x128xf32>
    %55 = vector.shape_cast %10 : vector<8x1xi1> to vector<8x1xi1>
    %56 = vector.broadcast %55 : vector<8x1xi1> to vector<8x128xi1>
    %57 = arith.select %56, %54, %53 : vector<8x128xi1>, vector<8x128xf32>
    %58 = arith.minimumf %52, %57 : vector<8x128xf32>
    %59 = arith.maximumf %52, %57 : vector<8x128xf32>
    %60 = arith.xori %10, %22 : vector<8x1xi1>
    %cst_18 = arith.constant dense<true> : vector<8x1xi1>
    %61 = arith.xori %60, %cst_18 : vector<8x1xi1>
    %62 = vector.shape_cast %61 : vector<8x1xi1> to vector<8x1xi1>
    %63 = vector.broadcast %62 : vector<8x1xi1> to vector<8x128xi1>
    %64 = arith.select %63, %58, %59 : vector<8x128xi1>, vector<8x128xf32>
    %c4_i32 = arith.constant 4 : i32
    %65 = tpu.dynamic_rotate %64 by %c4_i32 dim 0 : vector<8x128xf32>, i32 -> vector<8x128xf32>
    %c4_i32_19 = arith.constant 4 : i32
    %66 = tpu.dynamic_rotate %64 by %c4_i32_19 dim 0 : vector<8x128xf32>, i32 -> vector<8x128xf32>
    %67 = vector.shape_cast %22 : vector<8x1xi1> to vector<8x1xi1>
    %68 = vector.broadcast %67 : vector<8x1xi1> to vector<8x128xi1>
    %69 = arith.select %68, %66, %65 : vector<8x128xi1>, vector<8x128xf32>
    %70 = arith.minimumf %64, %69 : vector<8x128xf32>
    %71 = arith.maximumf %64, %69 : vector<8x128xf32>
    %72 = arith.xori %22, %28 : vector<8x1xi1>
    %cst_20 = arith.constant dense<true> : vector<8x1xi1>
    %73 = arith.xori %72, %cst_20 : vector<8x1xi1>
    %74 = vector.shape_cast %73 : vector<8x1xi1> to vector<8x1xi1>
    %75 = vector.broadcast %74 : vector<8x1xi1> to vector<8x128xi1>
    %76 = arith.select %75, %70, %71 : vector<8x128xi1>, vector<8x128xf32>
    %c6_i32_21 = arith.constant 6 : i32
    %77 = tpu.dynamic_rotate %76 by %c6_i32_21 dim 0 : vector<8x128xf32>, i32 -> vector<8x128xf32>
    %c2_i32_22 = arith.constant 2 : i32
    %78 = tpu.dynamic_rotate %76 by %c2_i32_22 dim 0 : vector<8x128xf32>, i32 -> vector<8x128xf32>
    %79 = vector.shape_cast %16 : vector<8x1xi1> to vector<8x1xi1>
    %80 = vector.broadcast %79 : vector<8x1xi1> to vector<8x128xi1>
    %81 = arith.select %80, %78, %77 : vector<8x128xi1>, vector<8x128xf32>
    %82 = arith.minimumf %76, %81 : vector<8x128xf32>
    %83 = arith.maximumf %76, %81 : vector<8x128xf32>
    %84 = arith.xori %16, %28 : vector<8x1xi1>
    %cst_23 = arith.constant dense<true> : vector<8x1xi1>
    %85 = arith.xori %84, %cst_23 : vector<8x1xi1>
    %86 = vector.shape_cast %85 : vector<8x1xi1> to vector<8x1xi1>
    %87 = vector.broadcast %86 : vector<8x1xi1> to vector<8x128xi1>
    %88 = arith.select %87, %82, %83 : vector<8x128xi1>, vector<8x128xf32>
    %c7_i32_24 = arith.constant 7 : i32
    %89 = tpu.dynamic_rotate %88 by %c7_i32_24 dim 0 : vector<8x128xf32>, i32 -> vector<8x128xf32>
    %c1_i32_25 = arith.constant 1 : i32
    %90 = tpu.dynamic_rotate %88 by %c1_i32_25 dim 0 : vector<8x128xf32>, i32 -> vector<8x128xf32>
    %91 = vector.shape_cast %10 : vector<8x1xi1> to vector<8x1xi1>
    %92 = vector.broadcast %91 : vector<8x1xi1> to vector<8x128xi1>
    %93 = arith.select %92, %90, %89 : vector<8x128xi1>, vector<8x128xf32>
    %94 = arith.minimumf %88, %93 : vector<8x128xf32>
    %95 = arith.maximumf %88, %93 : vector<8x128xf32>
    %96 = arith.xori %10, %28 : vector<8x1xi1>
    %cst_26 = arith.constant dense<true> : vector<8x1xi1>
    %97 = arith.xori %96, %cst_26 : vector<8x1xi1>
    %98 = vector.shape_cast %97 : vector<8x1xi1> to vector<8x1xi1>
    %99 = vector.broadcast %98 : vector<8x1xi1> to vector<8x128xi1>
    %100 = arith.select %99, %94, %95 : vector<8x128xi1>, vector<8x128xf32>
    %c0_27 = arith.constant 0 : index
    %c0_28 = arith.constant 0 : index
    %c0_29 = arith.constant 0 : index
    %101 = vector.load %arg3[%c0_27, %c0_28, %c0_29] : memref<1x8x128xf32, #tpu.memory_space<vmem>>, vector<1x8x128xf32>
    %102 = vector.shape_cast %101 : vector<1x8x128xf32> to vector<8x128xf32>
    %103 = vector.shape_cast %100 : vector<8x128xf32> to vector<1x8x128xf32>
    tpu.vector_store %arg3[%c0_27, %c0_28, %c0_29], %103 {strides = array<i32>} : memref<1x8x128xf32, #tpu.memory_space<vmem>>, vector<1x8x128xf32>,
    return
  }
  func.func @transform_0(%arg0: i32) -> (i32, i32, i32) {
    %c0_i32 = arith.constant 0 : i32
    %c0_i32_0 = arith.constant 0 : i32
    %c0_i32_1 = arith.constant 0 : i32
    return %arg0, %c0_i32, %c0_i32_0 : i32, i32, i32
  }
  func.func @transform_1(%arg0: i32) -> (i32, i32) {
    %c0_i32 = arith.constant 0 : i32
    %c0_i32_0 = arith.constant 0 : i32
    %c0_i32_1 = arith.constant 0 : i32
    return %c0_i32, %c0_i32_0 : i32, i32
  }
  func.func @transform_2(%arg0: i32) -> (i32, i32, i32) {
    %c0_i32 = arith.constant 0 : i32
    %c0_i32_0 = arith.constant 0 : i32
    %c0_i32_1 = arith.constant 0 : i32
    return %arg0, %c0_i32, %c0_i32_0 : i32, i32, i32
  }
}

</mosaic_0001>

<bundles_post_ra>
// kernel: tpu_custom_call.1
= control target key start
LH: loop header
LB: loop body
LE: loop exit
PB: predicated region body
PF: predicated region fallthrough
CT: control target
= control target key end

     0   :  { %7 = vsyncpa [#allocation3], 0  ;;  %s449_s0 = inlined_call_operand.hbm [shape: f32[1,8,16], index: 0, kind: input, shape index: {}]   ;;  %s450_s1 = inlined_call_operand.hbm [shape: f32[16,128], index: 1, kind: input, shape index: {}]   ;;  %s451_s2 = inlined_call_operand.hbm [shape: f32[1,8,128], index: 2, kind: output, shape index: {}]  }
   0x1   :  { %8 = vsyncpa [#allocation6], 0 }
   0x2   :  { %9 = vsyncpa [#allocation4], 0  ;;  %s15_s11 = sshll.u32 %s449_s0, 4  ;;  %s386_s12 = smov [#allocation2]   ;;  %s16_s11 = int_to_ptr.hbm [resolvable:$true] %s15_s11 }
   0x3   :  { %s17_s13 = sshll.u32 %s386_s12, 4  ;;  %s25_s16 = sshll.u32 %s450_s1, 4  ;;  %s18_s13 = int_to_ptr.vmem [resolvable:$true] %s17_s13  ;;  %s26_s16 = int_to_ptr.hbm [resolvable:$true] %s25_s16 }
   0x4   :  { %20 = dma.hbm_to_vmem [thread:$0]  %s16_s11, 128, %s18_s13, [#allocation3]  }
   0x5   :  { %s387_s17 = smov [#allocation5]   ;;  %s388_s19 = smov 128  }
   0x6   :  { %s27_s18 = sshll.u32 %s387_s17, 4  ;;  %s389_s20 = smov 8   ;;  %s28_s18 = int_to_ptr.vmem [resolvable:$true] %s27_s18 }
   0x7   :  { %33 = dma.hbm_to_vmem [thread:$0]  %s26_s16, 256, %s28_s18, [#allocation6], %s388_s19, %s388_s19, %s389_s20  }
   0x8   :  { %380 = dma.done.wait [#allocation3], 128  }
   0x9   :  { %381 = vsyncadd [#allocation3], 4294967168 }
   0xa   :  { %382 = dma.done.wait [#allocation6], 256  }
   0xb   :  { %383 = vsyncadd [#allocation6], 4294967040  ;;  %vm45_vm0 = vcmask 130048   ;;  %v44_v0 = vld [vmem:[#allocation5 + $0x8] sm:$0xff]  ;;  %v43_v1 = vld [vmem:[#allocation5] sm:$0xff]  ;;  %v208_v19 = vlaneseq  ;;  %vm390_vm4 = vmmov 1  }
   0xc   :  { %v42_v2 = vld [vmem:[#allocation2] sm:$0xff]  ;;  %v63_v3 = vand.u32 4294901760, %v44_v0  ;;  %v65_v4 = vand.u32 4294901760, %v43_v1  ;;  %s391_s0 = smov [#allocation7]   ;;  %s291_s23 = sshll.u32 %s451_s2, 4  ;;  %s292_s23 = int_to_ptr.hbm [resolvable:$true] %s291_s23 }
   0xd   :  { %v47_v5 = vsel %vm45_vm0, %v42_v2, 0  ;;  %v209_v20 = vshrl.u32 %v208_v19, 7  ;;  %s289_s1 = sshll.u32 %s391_s0, 4  ;;  %s290_s1 = int_to_ptr.vmem [resolvable:$true] %s289_s1 }
   0xe   :  { %v67_v6 = vand.u32 4294901760, %v47_v5  ;;  %v91_v7 = vsub.f32 %v44_v0, %v63_v3  ;;  %64 = vmatpush.msra.mxu0 %v63_v3  ;;  %v97_v8 = vsub.f32 %v43_v1, %v65_v4  ;;  %148 = vmatpush.msra.mxu3 %v63_v3 }
   0xf   :  { %v212_v22 = vshra.s32 %v209_v20, 1  ;;  %v210_v28 = vand.u32 1, %v209_v20  ;;  %v215_v31 = vshra.s32 %v209_v20, 2  ;;  %v218_v44 = vshra.s32 %v209_v20, 3 }
  0x10   :  { %v68_v9 = vsub.f32 %v47_v5, %v67_v6  ;;  %123 = vmatpush.msra.mxu2 %v91_v7  ;;  %66 = vmatpush.msra.mxu0 %v65_v4  ;;  %v92_v10 = vand.u32 4294901760, %v91_v7  ;;  %v98_v11 = vand.u32 4294901760, %v97_v8 }
  0x11   :  { %150 = vmatpush.msra.mxu3 %v65_v4  ;;  %v213_v29 = vand.u32 1, %v212_v22  ;;  %vm413_vm1 = vcmp.eq.s32.totalorder %v210_v28, 1  ;;  %v216_v37 = vand.u32 1, %v215_v31  ;;  %v219_v50 = vand.u32 1, %v218_v44 }
  0x12   :  { %v69_v12 = vand.u32 4294901760, %v68_v9  ;;  %126 = vmatpush.msra.mxu2 %v97_v8  ;;  %v93_v13 = vsub.f32 %v91_v7, %v92_v10  ;;  %175 = vmatpush.msrb.mxu0 %v92_v10  ;;  %v99_v14 = vsub.f32 %v97_v8, %v98_v11 }
  0x13   :  { %129 = vmatmul.f32.vlgmr.msra.gmra.mxu2 %v68_v9  ;;  %vm214_vm2 = vcmp.eq.s32.totalorder %v213_v29, 1  ;;  %vm217_vm6 = vcmp.eq.s32.totalorder %v216_v37, 1  ;;  %vm220_vm10 = vcmp.eq.s32.totalorder %v219_v50, 1 }
  0x14   :  { %v70_v15 = vsub.f32 %v68_v9, %v69_v12  ;;  %154 = vmatmul.f32.vlgmr.msra.gmra.mxu3 %v69_v12  ;;  %v94_v16 = vand.u32 4294901760, %v93_v13  ;;  %v100_v17 = vand.u32 4294901760, %v99_v14  ;;  %179 = vmatpush.msrb.mxu0 %v98_v11  ;;  %vm228_vm3 = vmxor %vm413_vm1, %vm214_vm2 }
  0x15   :  { %vm229_vm5 = vmxor %vm228_vm3, %vm390_vm4 }
  0x16   :  { %v71_v18 = vand.u32 4294901760, %v70_v15  ;;  %95 = vmatpush.msra.mxu1 %v94_v16  ;;  %vm240_vm7 = vmxor %vm214_vm2, %vm217_vm6 }
  0x17   :  { %vm241_vm8 = vmxor %vm240_vm7, %vm390_vm4 }
  0x18   :  { %72 = vmatmul.f32.vlgmr.msra.gmra.mxu0 %v71_v18  ;;  %101 = vmatpush.msra.mxu1 %v100_v17  ;;  %vm250_vm9 = vmxor %vm413_vm1, %vm217_vm6 }
  0x19   :  { %103 = vmatmul.f32.vlgmr.msra.gmra.mxu1 %v67_v6  ;;  %vm251_vm11 = vmxor %vm250_vm9, %vm390_vm4 }
  0x1a   :  { %200 = vmatpush.msrb.mxu1 %v63_v3  ;;  %vm258_vm12 = vmxor %vm217_vm6, %vm220_vm10 }
  0x1b   :  { %vm259_vm13 = vmxor %vm258_vm12, %vm390_vm4 }
  0x1c   :  { %202 = vmatpush.msrb.mxu1 %v65_v4  ;;  %vm268_vm14 = vmxor %vm214_vm2, %vm220_vm10 }
  0x1d   :  { %vm269_vm15 = vmxor %vm268_vm14, %vm390_vm4 }
  0x1e   :  { %vm278_vm0 = vmxor %vm413_vm1, %vm220_vm10 }
  0x20   :  { %181 = vmatmul.f32.vlgmr.msrb.gmra.mxu0 %v67_v6 }
  0x21   :  { %204 = vmatmul.f32.vlgmr.msrb.gmra.mxu1 %v67_v6 }
  0x95   :  { %v73_v21 = vpop.f32.mrf.mxu0 }
  0x96   :  { %v104_v23 = vpop.f32.mrf.mxu1  ;;  %v130_v24 = vpop.f32.mrf.mxu2 }
  0x97   :  { %v105_v25 = vadd.f32 %v104_v23, %v73_v21  ;;  %v155_v26 = vpop.f32.mrf.mxu3 }
  0x99   :  { %v131_v27 = vadd.f32 %v130_v24, %v105_v25 }
  0x9b   :  { %v156_v30 = vadd.f32 %v155_v26, %v131_v27 }
  0x9d   :  { %v182_v32 = vpop.f32.mrf.mxu0 }
  0x9e   :  { %v183_v33 = vadd.f32 %v182_v32, %v156_v30  ;;  %v205_v35 = vpop.f32.mrf.mxu1 }
  0xa0   :  { %v206_v36 = vadd.f32 %v205_v35, %v183_v33 }
  0xa2   :  { %v221_v38 = vrot.slane %v206_v36, 1  ;;  %v222_v39 = vrot.slane %v206_v36, 7 }
  0xa4   :  { %v225_v40 = vsel %vm413_vm1, %v222_v39, %v221_v38 }
  0xa5   :  { %v226_v41 = vmin.f32 %v206_v36, %v225_v40  ;;  %v227_v42 = vmax.f32 %v206_v36, %v225_v40 }
  0xa7   :  { %v232_v43 = vsel %vm229_vm5, %v226_v41, %v227_v42 }
  0xa8   :  { %v233_v45 = vrot.slane %v232_v43, 2  ;;  %v234_v46 = vrot.slane %v232_v43, 6 }
  0xaa   :  { %v237_v47 = vsel %vm214_vm2, %v234_v46, %v233_v45 }
  0xab   :  { %v238_v48 = vmin.f32 %v232_v43, %v237_v47  ;;  %v239_v49 = vmax.f32 %v232_v43, %v237_v47 }
  0xad   :  { %v244_v51 = vsel %vm241_vm8, %v238_v48, %v239_v49 }
  0xae   :  { %v245_v52 = vrot.slane %v244_v51, 1  ;;  %v246_v53 = vrot.slane %v244_v51, 7 }
  0xb0   :  { %v247_v54 = vsel %vm413_vm1, %v246_v53, %v245_v52 }
  0xb1   :  { %v248_v55 = vmin.f32 %v244_v51, %v247_v54  ;;  %v249_v56 = vmax.f32 %v244_v51, %v247_v54 }
  0xb3   :  { %v254_v57 = vsel %vm251_vm11, %v248_v55, %v249_v56 }
  0xb4   :  { %v255_v58 = vrot.slane %v254_v57, 4 }
  0xb6   :  { %v256_v59 = vmin.f32 %v254_v57, %v255_v58  ;;  %v257_v60 = vmax.f32 %v254_v57, %v255_v58 }
  0xb8   :  { %v262_v61 = vsel %vm259_vm13, %v256_v59, %v257_v60 }
  0xb9   :  { %v263_v62 = vrot.slane %v262_v61, 2  ;;  %v264_v63 = vrot.slane %v262_v61, 6 }
  0xbb   :  { %v265_v0 = vsel %vm214_vm2, %v264_v63, %v263_v62  ;;  %vm279_vm2 = vmxor %vm278_vm0, %vm390_vm4 }
  0xbc   :  { %v266_v1 = vmin.f32 %v262_v61, %v265_v0  ;;  %v267_v2 = vmax.f32 %v262_v61, %v265_v0 }
  0xbe   :  { %v272_v3 = vsel %vm269_vm15, %v266_v1, %v267_v2 }
  0xbf   :  { %v273_v4 = vrot.slane %v272_v3, 1  ;;  %v274_v5 = vrot.slane %v272_v3, 7 }
  0xc1   :  { %v275_v6 = vsel %vm413_vm1, %v274_v5, %v273_v4 }
  0xc2   :  { %v276_v7 = vmin.f32 %v272_v3, %v275_v6  ;;  %v277_v8 = vmax.f32 %v272_v3, %v275_v6 }
  0xc4   :  { %v282_v9 = vsel %vm279_vm2, %v276_v7, %v277_v8 }
  0xc5   :  { %283 = vst [vmem:[#allocation7] sm:$0xff] %v282_v9 }
  0xc6   :  { %294 = dma.vmem_to_hbm [thread:$0]  %s290_s1, 128, %s292_s23, [#allocation4]  }
  0xc7   :  { %384 = dma.done.wait [#allocation4], 128  }
  0xc8   :  { %385 = vsyncadd [#allocation4], 4294967168 }
  0xc9   :  { %299 = vsyncpa [#allocation3], 1 }
  0xca   :  { %300 = vsyncpa [#allocation6], 1 }
  0xcb   :  { %301 = vsyncpa [#allocation4], 1 }

</bundles_post_ra>
